<compile_context>
chip_gen: v7x
topology: tpu7x:2x2x1
jax: 0.10.0
libtpu: 0.0.40
codegen_flags: <defaults>
</compile_context>

<pallas_src>
import functools

import jax
import jax.numpy as jnp
from jax.experimental import pallas as pl
from jax.experimental.pallas import tpu as pltpu

_LANES = 128


# --------------------------------------------------------------------------- #
# Kernels                                                                      #
# --------------------------------------------------------------------------- #
def _pool_stream_kernel(x_ref, o_ref, *, pooling_type, n):
    """x_ref: (N, S, 128) VMEM tile; o_ref: (1, S, 128) pooled-only tile.

    Streaming reduce over the (leading, non-vreg) stack axis: each x_ref[i] is
    a dense (S, 128) slab, so the reduction is pure elementwise VPU work and
    the live set is one accumulator + one incoming slice.
    """
    if pooling_type == "avg":
        in_dt = jnp.dtype(x_ref.dtype)
        acc_dt = jnp.float32 if in_dt.itemsize < 4 else x_ref.dtype
        acc = x_ref[0].astype(acc_dt)
        for i in range(1, n):                     # static, unrolled (n is small)
            acc = acc + x_ref[i].astype(acc_dt)
        pooled = acc * (1.0 / n)
    elif pooling_type == "max":
        pooled = x_ref[0]
        for i in range(1, n):
            pooled = jnp.maximum(pooled, x_ref[i])
    else:
        raise NotImplementedError(f"Pooling type {pooling_type} not implemented")
    # Cast exactly once, on the pooled slab, then a single store.
    o_ref[0] = pooled.astype(o_ref.dtype)


def _pool_flat_kernel(x_ref, o_ref, *, pooling_type):
    """Fallback for C*H*W not a multiple of 128 (no wrapper-side padding).

    x_ref: (N, B) VMEM tile (B multiple of 128, ragged last block masked by
    Pallas); o_ref: (1, B).  Reduce is over axis 0 (sublanes) — cheap XLU work
    fully hidden under the HBM DMAs.
    """
    if pooling_type == "avg":
        in_dt = jnp.dtype(x_ref.dtype)
        acc_dt = jnp.float32 if in_dt.itemsize < 4 else x_ref.dtype
        pooled = jnp.mean(x_ref[...].astype(acc_dt), axis=0, keepdims=True)
    elif pooling_type == "max":
        pooled = jnp.max(x_ref[...], axis=0, keepdims=True)
    else:
        raise NotImplementedError(f"Pooling type {pooling_type} not implemented")
    o_ref[...] = pooled.astype(o_ref.dtype)


# --------------------------------------------------------------------------- #
# Tiling helpers                                                               #
# --------------------------------------------------------------------------- #
def _vmem_budget():
    """(tiling budget bytes, scoped-VMEM limit bytes), per TPU generation.

    v5e/v6e have 128 MiB physical VMEM -> go big; v7x has only 64 MiB (32 MiB
    scoped default) -> keep the double-buffered working set small.
    """
    try:
        cap = int(pltpu.get_tpu_info().vmem_capacity_bytes)
    except Exception:
        cap = 64 << 20                      # conservative (v7x-sized) fallback
    if cap >= (96 << 20):                   # v5e / v6e (128 MiB)
        return 24 << 20, 64 << 20
    return 16 << 20, 32 << 20               # v7x (64 MiB)


def _pick_block_rows(rows, per_row_bytes, budget_bytes, max_rows=4096):
    """Rows-per-block: multiple of 8 sized from an honest per-row footprint
    (double-buffered in + out blocks plus reduce temporaries).  Large inputs
    are split into >=2 grid steps so v7x's two TensorCores both get work."""
    s = max(8, min(int(budget_bytes // per_row_bytes), max_rows))
    s -= s % 8
    if rows <= s:
        if rows > 8:
            # Whole input fits in one block -> split into (at least) two.
            s = ((-(-rows // 2)) + 7) // 8 * 8
        else:
            s = rows                        # tiny input: full-extent block
    return s


# --------------------------------------------------------------------------- #
# Wrapper                                                                      #
# --------------------------------------------------------------------------- #
def stack_feature_pooling(feat_stack, pooling_type="avg"):
    """feat_stack: (N, C, H, W) array. Returns (N, C, H, W) broadcast of the pool."""
    if pooling_type not in ("avg", "max"):
        raise NotImplementedError(f"Pooling type {pooling_type} not implemented")
    n, c, h, w = feat_stack.shape
    m = c * h * w
    dtype = feat_stack.dtype
    itemsize = jnp.dtype(dtype).itemsize
    if pooling_type == "avg" and not jnp.issubdtype(dtype, jnp.floating):
        # torch.mean rejects integer tensors; mirror that instead of silently
        # truncating a float mean back to int.
        raise TypeError("avg pooling requires a floating-point feat_stack")

    if n == 1:
        # mean/max over a single stack entry followed by expand_as is identity.
        return feat_stack

    acc_itemsize = max(itemsize, 4) if pooling_type == "avg" else itemsize
    budget, vmem_limit = _vmem_budget()
    compiler_params = pltpu.CompilerParams(
        dimension_semantics=("parallel",),
        vmem_limit_bytes=vmem_limit,
    )
    cost = pl.CostEstimate(
        flops=n * m,
        transcendentals=0,
        bytes_accessed=(n + 1) * m * itemsize,   # N*M read + M pooled write
    )

    x2d = feat_stack.reshape(n, m)

    if m % _LANES == 0:
        # ---- lane-dense (N, rows, 128) layout, streaming VPU reduce ---------
        rows = m // _LANES
        # in (2 bufs) + out (2 bufs) + f32 accumulator + one upcast slice:
        per_row = _LANES * ((2 * n + 2) * itemsize + 2 * acc_itemsize)
        s = _pick_block_rows(rows, per_row, budget)
        x3d = x2d.reshape(n, rows, _LANES)
        grid = (pl.cdiv(rows, s),)               # ragged last block is masked
        pooled = pl.pallas_call(
            functools.partial(_pool_stream_kernel, pooling_type=pooling_type, n=n),
            out_shape=jax.ShapeDtypeStruct((1, rows, _LANES), dtype),
            grid_spec=pltpu.PrefetchScalarGridSpec(
                num_scalar_prefetch=0,
                grid=grid,
                in_specs=[pl.BlockSpec((n, s, _LANES), lambda j: (0, j, 0))],
                out_specs=pl.BlockSpec((1, s, _LANES), lambda j: (0, j, 0)),
            ),
            compiler_params=compiler_params,
            cost_estimate=cost,
        )(x3d)
        pooled2d = pooled.reshape(1, m)
    else:
        # ---- no-pad fallback: 2-D (N, M), ragged last lane block masked -----
        rows = pl.cdiv(m, _LANES)
        # sublane-padded in bufs + out bufs + whole-tile upcast + pooled temp:
        n_pad = ((n + 7) // 8) * 8
        per_row = _LANES * (2 * n_pad * itemsize + 16 * itemsize
                            + (n + 1) * acc_itemsize)
        s = _pick_block_rows(rows, per_row, budget)
        b = s * _LANES
        if b >= m:
            b = m                                # full-extent block, grid = 1
        grid = (pl.cdiv(m, b),)
        pooled2d = pl.pallas_call(
            functools.partial(_pool_flat_kernel, pooling_type=pooling_type),
            out_shape=jax.ShapeDtypeStruct((1, m), dtype),
            grid_spec=pltpu.PrefetchScalarGridSpec(
                num_scalar_prefetch=0,
                grid=grid,
                in_specs=[pl.BlockSpec((n, b), lambda j: (0, j))],
                out_specs=pl.BlockSpec((1, b), lambda j: (0, j)),
            ),
            compiler_params=compiler_params,
            cost_estimate=cost,
        )(x2d)

    pooled4d = pooled2d.reshape(1, c, h, w)
    # expand_as: lazy broadcast; XLA fuses it into consumers in most cases, so
    # the N identical copies are (usually) never written to HBM.
    return jnp.broadcast_to(pooled4d, (n, c, h, w))


# --------------------------------------------------------------------------- #
# Reference + self-test                                                        #
# --------------------------------------------------------------------------- #
def _reference(feat_stack, pooling_type="avg"):
    if pooling_type == "avg":
        pooled = jnp.mean(feat_stack.astype(jnp.float32), axis=0,
                          keepdims=True).astype(feat_stack.dtype)
    else:
        pooled = jnp.max(feat_stack, axis=0, keepdims=True)
    return jnp.broadcast_to(pooled, feat_stack.shape)


if __name__ == "__main__":
    key = jax.random.PRNGKey(0)
    k1, k2, k3, k4 = jax.random.split(key, 4)

    # Case 1: aligned path (C*H*W = 1024), f32, N=2.
    x1 = jax.random.normal(k1, (2, 4, 16, 16), dtype=jnp.float32)
    out = jax.block_until_ready(stack_feature_pooling(x1, "avg"))
    assert out.shape == x1.shape
    assert jnp.allclose(out, _reference(x1, "avg"), atol=1e-6, rtol=1e-6)
    out = jax.block_until_ready(stack_feature_pooling(x1, "max"))
    assert jnp.allclose(out, _reference(x1, "max"), atol=1e-6, rtol=1e-6)

    # Case 2: unaligned path (C*H*W = 500) — no wrapper-side padding/slicing.
    x2 = jax.random.normal(k2, (3, 5, 10, 10), dtype=jnp.float32)
    out = jax.block_until_ready(stack_feature_pooling(x2, "avg"))
    assert jnp.allclose(out, _reference(x2, "avg"), atol=1e-6, rtol=1e-6)
    out = jax.block_until_ready(stack_feature_pooling(x2, "max"))
    assert jnp.allclose(out, _reference(x2, "max"), atol=1e-6, rtol=1e-6)

    # Case 3: aligned path with a ragged (masked) last rows-block: rows = 9.
    x3 = jax.random.normal(k3, (2, 9, 8, 16), dtype=jnp.float32)   # C*H*W = 1152
    out = jax.block_until_ready(stack_feature_pooling(x3, "avg"))
    assert jnp.allclose(out, _reference(x3, "avg"), atol=1e-6, rtol=1e-6)
    out = jax.block_until_ready(stack_feature_pooling(x3, "max"))
    assert jnp.allclose(out, _reference(x3, "max"), atol=1e-6, rtol=1e-6)

    # Case 4: bf16, N=4 (f32 accumulation in-kernel, multi-step grid).
    x4 = jax.random.normal(k4, (4, 8, 16, 16), dtype=jnp.bfloat16)  # C*H*W = 2048
    out = jax.block_until_ready(stack_feature_pooling(x4, "avg"))
    assert jnp.allclose(out.astype(jnp.float32),
                        _reference(x4, "avg").astype(jnp.float32),
                        atol=1e-2, rtol=1e-2)
    out = jax.block_until_ready(stack_feature_pooling(x4, "max"))
    assert jnp.allclose(out.astype(jnp.float32),
                        _reference(x4, "max").astype(jnp.float32),
                        atol=1e-6, rtol=1e-6)

    print("KERNEL_OK")
</pallas_src>

<mosaic_0001>
module attributes {stable_mosaic.version = 11 : i64} {
  func.func @_pool_stream_kernel(%arg0: i32, %arg1: memref<2x8x128xf32, #tpu.memory_space<vmem>>, %arg2: memref<1x8x128xf32, #tpu.memory_space<vmem>>) attributes {dimension_semantics = [#tpu.dimension_semantics<parallel>], iteration_bounds = array<i64: 1>, scalar_prefetch = 0 : i64, scratch_operands = 0 : i64, tpu.core_type = #tpu.core_type<tc>, window_params = [{transform_indices = @transform_0, window_bounds = array<i64: 2, 8, 128>}, {transform_indices = @transform_1, window_bounds = array<i64: 1, 8, 128>}]} {
    %c0 = arith.constant 0 : index
    %c0_0 = arith.constant 0 : index
    %c0_1 = arith.constant 0 : index
    %0 = vector.load %arg1[%c0, %c0_0, %c0_1] : memref<2x8x128xf32, #tpu.memory_space<vmem>>, vector<1x8x128xf32>
    %1 = vector.shape_cast %0 : vector<1x8x128xf32> to vector<8x128xf32>
    %c1 = arith.constant 1 : index
    %c0_2 = arith.constant 0 : index
    %c0_3 = arith.constant 0 : index
    %2 = vector.load %arg1[%c1, %c0_2, %c0_3] : memref<2x8x128xf32, #tpu.memory_space<vmem>>, vector<1x8x128xf32>
    %3 = vector.shape_cast %2 : vector<1x8x128xf32> to vector<8x128xf32>
    %4 = arith.addf %1, %3 : vector<8x128xf32>
    %cst = arith.constant 5.000000e-01 : f32
    %5 = vector.broadcast %cst : f32 to vector<8x128xf32>
    %6 = arith.mulf %4, %5 : vector<8x128xf32>
    %c0_4 = arith.constant 0 : index
    %c0_5 = arith.constant 0 : index
    %c0_6 = arith.constant 0 : index
    %7 = vector.load %arg2[%c0_4, %c0_5, %c0_6] : memref<1x8x128xf32, #tpu.memory_space<vmem>>, vector<1x8x128xf32>
    %8 = vector.shape_cast %7 : vector<1x8x128xf32> to vector<8x128xf32>
    %9 = vector.shape_cast %6 : vector<8x128xf32> to vector<1x8x128xf32>
    tpu.vector_store %arg2[%c0_4, %c0_5, %c0_6], %9 {strides = array<i32>} : memref<1x8x128xf32, #tpu.memory_space<vmem>>, vector<1x8x128xf32>,
    return
  }
  func.func @transform_0(%arg0: i32) -> (i32, i32, i32) {
    %c0_i32 = arith.constant 0 : i32
    %c0_i32_0 = arith.constant 0 : i32
    %c0_i32_1 = arith.constant 0 : i32
    return %c0_i32, %arg0, %c0_i32_0 : i32, i32, i32
  }
  func.func @transform_1(%arg0: i32) -> (i32, i32, i32) {
    %c0_i32 = arith.constant 0 : i32
    %c0_i32_0 = arith.constant 0 : i32
    %c0_i32_1 = arith.constant 0 : i32
    return %c0_i32, %arg0, %c0_i32_0 : i32, i32, i32
  }
}

</mosaic_0001>

<bundles_post_ra>
// kernel: tpu_custom_call.1
= control target key start
LH: loop header
LB: loop body
LE: loop exit
PB: predicated region body
PF: predicated region fallthrough
CT: control target
= control target key end

     0   :  { %6 = vsyncpa [#allocation3], 0  ;;  %s134_s0 = inlined_call_operand.hbm [shape: f32[2,8,128], index: 0, kind: input, shape index: {}]   ;;  %s135_s1 = inlined_call_operand.hbm [shape: f32[1,8,128], index: 1, kind: output, shape index: {}]  }
   0x1   :  { %7 = vsyncpa [#allocation4], 0  ;;  %s96_s6 = smov [#allocation2]   ;;  %s48_s10 = scalar_lea.hbm %s134_s0, 256 }
   0x2   :  { %s13_s7 = sshll.u32 %s96_s6, 4  ;;  %p49_p0 = scmp.ne.s32.totalorder %s134_s0, %s48_s10  ;;  %s14_s7 = int_to_ptr.vmem [resolvable:$true] %s13_s7 }
   0x3   :  { %p52_p1 = scmp.lt.u32.totalorder %s48_s10, %s134_s0 }
   0x5   :  { %p54_p2 = pnand %p52_p1, %p49_p0 }
   0x7   :  { %57 = shalt.err (!%p54_p2)
}
   0x8   :  { %s58_s15 = scalar_lea.vmem %s14_s7, 256  ;;  %p63_p4 = scmp.lt.s32.totalorder %s14_s7, %s14_s7 }
   0x9   :  { %p59_p3 = scmp.ne.s32.totalorder %s14_s7, %s58_s15  ;;  %p64_p5 = scmp.lt.s32.totalorder %s58_s15, %s58_s15 }
   0xb   :  { %p65_p6 = por %p64_p5, %p63_p4 }
   0xd   :  { %p66_p7 = pnand %p65_p6, %p59_p3 }
   0xf   :  { %69 = shalt.err (!%p66_p7)
}
  0x10   :  { %s97_s16 = smov 128   ;;  %s98_s17 = smov 8  }
  0x11   :  { %19 = dma.hbm_to_vmem [thread:$0]  %s134_s0, 256, %s14_s7, [#allocation3], %s97_s16, %s97_s16, %s98_s17  }
  0x12   :  { %92 = dma.done.wait [#allocation3], 256  }
  0x13   :  { %93 = vsyncadd [#allocation3], 4294967040  ;;  %v23_v0 = vld [vmem:[#allocation2] sm:$0xff]  ;;  %v25_v1 = vld [vmem:[#allocation2 + $0x8] sm:$0xff]  ;;  %s99_s20 = smov [#allocation5]  }
  0x14   :  { %s35_s21 = sshll.u32 %s99_s20, 4  ;;  %v26_v2 = vadd.f32 %v25_v1, %v23_v0  ;;  %s36_s21 = int_to_ptr.vmem [resolvable:$true] %s35_s21 }
  0x15   :  { %s70_s22 = scalar_lea.vmem %s36_s21, 128  ;;  %p75_p9 = scmp.lt.s32.totalorder %s36_s21, %s36_s21 }
  0x16   :  { %v27_v3 = vmul.f32 0.5, %v26_v2  ;;  %p71_p8 = scmp.ne.s32.totalorder %s36_s21, %s70_s22  ;;  %p76_p10 = scmp.lt.s32.totalorder %s70_s22, %s70_s22 }
  0x18   :  { %28 = vst [vmem:[#allocation5] sm:$0xff] %v27_v3  ;;  %p77_p11 = por %p76_p10, %p75_p9 }
  0x1a   :  { %p78_p12 = pnand %p77_p11, %p71_p8 }
  0x1c   :  { %81 = shalt.err (!%p78_p12)
}
  0x1d   :  { %s82_s0 = scalar_lea.hbm %s135_s1, 128 }
  0x1e   :  { %p83_p13 = scmp.ne.s32.totalorder %s135_s1, %s82_s0  ;;  %p86_p0 = scmp.lt.u32.totalorder %s82_s0, %s135_s1 }
  0x20   :  { %p88_p1 = pnand %p86_p0, %p83_p13 }
  0x22   :  { %91 = shalt.err (!%p88_p1)
}
  0x23   :  { %38 = dma.vmem_to_hbm [thread:$0]  %s36_s21, 128, %s135_s1, [#allocation4]  }
  0x24   :  { %94 = dma.done.wait [#allocation4], 128  }
  0x25   :  { %95 = vsyncadd [#allocation4], 4294967168 }
  0x26   :  { %42 = vsyncpa [#allocation3], 1 }
  0x27   :  { %43 = vsyncpa [#allocation4], 1 }

</bundles_post_ra>
